<compile_context>
chip_gen: v6e
topology: v6e:2x2x1
jax: 0.10.0
libtpu: 0.0.40
codegen_flags: <defaults>
</compile_context>

<pallas_src>
import math

import numpy as np

import jax
import jax.numpy as jnp
from jax.experimental import pallas as pl
from jax.experimental.pallas import tpu as pltpu


def _cdiv(a, b):
    return -(-a // b)


def _round_up(a, b):
    return _cdiv(a, b) * b


def _chip_config():
    """Best-effort chip dispatch: (per-buffer block budget, #TensorCores, prefer cached table)."""
    try:
        kind = jax.devices()[0].device_kind.lower()
    except Exception:
        kind = ""
    is_v5e = ("v5 lite" in kind) or ("v5e" in kind) or ("v5lite" in kind)
    is_v7 = ("v7" in kind) or ("tpu7" in kind)
    # Double-buffered output => 2x this per call; stays within scoped-VMEM defaults
    # (16 MiB on v5e, 32 MiB on v6e/v7x), so no vmem_limit_bytes override needed.
    block_budget = (6 << 20) if is_v5e else (12 << 20)
    num_tc = 2 if is_v7 else 1
    prefer_table = is_v7   # v7x: pure DMA slice beats VALU-bound sin recompute
    return block_budget, num_tc, prefer_table


def _pe_kernel(tab_ref, o_ref):
    """One (blk_rows, size) tile: sin(row * inv_freq + block_offset).

    tab_ref is (2, size): row 0 = inv_freq, row 1 = f64-folded offset for this
    block, i.e. fmod((start + block_base)*inv_freq + phase, 2*pi). The in-kernel
    residual `row*inv_freq` is small, keeping the f32 angle accurate.
    """
    rows = o_ref.shape[0]
    freq = tab_ref[0:1, :]                                         # (1, size)
    off = tab_ref[1:2, :]                                          # (1, size)
    row = jax.lax.broadcasted_iota(jnp.int32, (rows, 1), 0).astype(jnp.float32)
    o_ref[...] = jnp.sin(row * freq + off).astype(o_ref.dtype)


def _compute_pe_window(length, size, start, max_len, dtype):
    """(1, length, size) sinusoidal PE window computed on the fly (no max_len buffer)."""
    assert size % 2 == 0, "size must be even (as required by the torch module)"
    assert start + length <= max_len, "requested window exceeds max_len"

    block_budget, num_tc, _ = _chip_config()
    itemsize = jnp.dtype(dtype).itemsize
    sublane = max(8, 32 // itemsize)                    # 8 f32 / 16 bf16 / 32 int8
    vmem_row_bytes = _round_up(size, 128) * itemsize    # lane-padded VMEM footprint
    cap_rows = max(sublane, (block_budget // vmem_row_bytes) // sublane * sublane)

    n_rows = length
    n_blocks = max(1, _cdiv(n_rows, cap_rows))
    if num_tc > 1 and n_rows >= num_tc * sublane:
        n_blocks = max(n_blocks, num_tc)                # v7x: shard across both TCs
    blk_rows = _round_up(_cdiv(n_rows, n_blocks), sublane)
    n_blocks = _cdiv(n_rows, blk_rows)
    if n_blocks == 1:
        blk_rows = n_rows                               # full-dim block is always legal

    # ---- trace-time table (float64, range-reduced) --------------------------
    d = np.arange(size)
    inv_freq = np.exp((d - (d % 2)).astype(np.float64) * -(math.log(10000.0) / size))
    phase = np.where(d % 2 == 0, 0.0, np.pi / 2.0)
    block_base = (start + np.arange(n_blocks) * blk_rows).astype(np.float64)
    off = np.mod(block_base[:, None] * inv_freq[None, :] + phase[None, :], 2.0 * np.pi)
    tab = np.stack([np.broadcast_to(inv_freq, (n_blocks, size)), off], axis=1)
    tab = jnp.asarray(tab, dtype=jnp.float32)           # (n_blocks, 2, size)

    cost = pl.CostEstimate(
        flops=2 * length * size,
        transcendentals=length * size,
        bytes_accessed=length * size * itemsize + int(tab.size) * 4,
    )

    out = pl.pallas_call(
        _pe_kernel,
        out_shape=jax.ShapeDtypeStruct((1, length, size), dtype),
        grid=(n_blocks,),
        in_specs=[pl.BlockSpec((None, 2, size), lambda i: (i, 0, 0))],
        out_specs=pl.BlockSpec((None, blk_rows, size), lambda i: (0, i, 0)),
        compiler_params=pltpu.CompilerParams(dimension_semantics=("parallel",)),
        cost_estimate=cost,
    )(tab)
    return out                                           # (1, length, size)


# ---- cached-table path (default on v7x: forward becomes a pure slice) --------
_TABLE_CACHE = {}


def _pe_table(size, max_len, dtype):
    key = (int(size), int(max_len), jnp.dtype(dtype).name)
    tab = _TABLE_CACHE.get(key)
    if tab is None:
        tab = _compute_pe_window(max_len, size, 0, max_len, dtype)   # (1, max_len, size)
        _TABLE_CACHE[key] = tab
    return tab


def positional_embedding(x, size, start=None, max_len=5000, dtype=jnp.float32,
                         recompute=None):
    """Pallas equivalent of PositionalEmbedding(size, max_len).forward(x, start).

    `x` may be an int (the length) or an array whose shape[1] is the length,
    exactly as in the PyTorch module. Returns a (1, length, size) array.
    `recompute=None` picks per chip: on-the-fly sin on v5e/v6e, cached table on v7x.
    """
    if start is None:
        start = 0
    length = x if isinstance(x, int) else x.shape[1]
    assert size % 2 == 0, "size must be even (as required by the torch module)"
    assert start + length <= max_len, "requested window exceeds max_len"

    if recompute is None:
        _, _, prefer_table = _chip_config()
        recompute = not prefer_table

    if recompute:
        return _compute_pe_window(length, size, start, max_len, dtype)
    table = _pe_table(size, max_len, dtype)
    return table[:, start:start + length, :]


def _reference_pe(size, max_len):
    """float64 ground-truth replica of the torch buffer construction."""
    pos = np.arange(max_len, dtype=np.float64)[:, None]
    div = np.exp(np.arange(0, size, 2, dtype=np.float64) * -(math.log(10000.0) / size))
    pe = np.zeros((max_len, size), dtype=np.float64)
    pe[:, 0::2] = np.sin(pos * div)
    pe[:, 1::2] = np.cos(pos * div)
    return pe[None]                                      # (1, max_len, size)


if __name__ == "__main__":
    max_len = 5000

    # Case 1: array input (batch=2, seq=8, hidden=32), default start, recompute path.
    size = 32
    batch, seq = 2, 8
    key = jax.random.PRNGKey(0)
    x = jax.random.normal(key, (batch, seq, size), dtype=jnp.float32)  # only shape matters
    out = jax.block_until_ready(
        positional_embedding(x, size, start=None, max_len=max_len, recompute=True))

    # Case 2: int input with a nonzero start.
    out2 = jax.block_until_ready(
        positional_embedding(16, size, start=100, max_len=max_len, recompute=True))

    # Case 3: size that is a multiple of 128 (lane-dense natural layout).
    size3, seq3, start3 = 256, 40, 7
    out3 = jax.block_until_ready(
        positional_embedding(seq3, size3, start=start3, max_len=max_len, recompute=True))

    # Case 4: large start -> exercises the f64 per-block mod-2*pi offset fold.
    out4 = jax.block_until_ready(
        positional_embedding(16, size, start=4000, max_len=max_len, recompute=True))

    # Case 5: cached-table path (default on v7x), exercised explicitly on every chip.
    out5 = jax.block_until_ready(
        positional_embedding(seq, size, start=3, max_len=max_len, recompute=False))

    # Case 6: bf16 output (halves store bytes; compute stays f32 in-kernel).
    out6 = jax.block_until_ready(
        positional_embedding(seq, size, start=0, max_len=max_len,
                             dtype=jnp.bfloat16, recompute=True))

    ref32 = _reference_pe(size, max_len)
    ref256 = _reference_pe(size3, max_len)

    assert out.shape == (1, seq, size) and out.dtype == jnp.float32
    assert out2.shape == (1, 16, size)
    assert out3.shape == (1, seq3, size3)
    assert out4.shape == (1, 16, size)
    assert out5.shape == (1, seq, size)
    assert out6.shape == (1, seq, size) and out6.dtype == jnp.bfloat16

    # The f64-folded per-block offsets keep the in-kernel f32 angle small at the
    # positions tested, so the kernel matches the float64 ground truth tightly
    # (at pos ~5000 the torch f32 buffer itself is only ~2e-4 accurate).
    assert np.allclose(np.asarray(out), ref32[:, 0:seq], atol=1e-4, rtol=1e-5)
    assert np.allclose(np.asarray(out2), ref32[:, 100:116], atol=1e-4, rtol=1e-5)
    assert np.allclose(np.asarray(out3), ref256[:, start3:start3 + seq3], atol=1e-4, rtol=1e-5)
    assert np.allclose(np.asarray(out4), ref32[:, 4000:4016], atol=1e-4, rtol=1e-5)
    assert np.allclose(np.asarray(out5), ref32[:, 3:3 + seq], atol=1e-4, rtol=1e-5)
    assert np.allclose(np.asarray(out6, dtype=np.float64), ref32[:, 0:seq], atol=2e-2)

    print("KERNEL_OK")
</pallas_src>

<mosaic_0001>
module attributes {stable_mosaic.version = 11 : i64} {
  func.func @_pe_kernel(%arg0: i32, %arg1: memref<1x2x32xf32, #tpu.memory_space<vmem>>, %arg2: memref<1x8x32xf32, #tpu.memory_space<vmem>>) attributes {dimension_semantics = [#tpu.dimension_semantics<parallel>], iteration_bounds = array<i64: 1>, scalar_prefetch = 0 : i64, scratch_operands = 0 : i64, tpu.core_type = #tpu.core_type<tc>, window_params = [{transform_indices = @transform_0, window_bounds = array<i64: 1, 2, 32>}, {transform_indices = @transform_1, window_bounds = array<i64: 1, 8, 32>}]} {
    %c0 = arith.constant 0 : index
    %c0_0 = arith.constant 0 : index
    %c0_1 = arith.constant 0 : index
    %0 = vector.load %arg1[%c0, %c0_0, %c0_1] : memref<1x2x32xf32, #tpu.memory_space<vmem>>, vector<1x1x32xf32>
    %1 = vector.shape_cast %0 : vector<1x1x32xf32> to vector<1x32xf32>
    %c0_2 = arith.constant 0 : index
    %c1 = arith.constant 1 : index
    %c0_3 = arith.constant 0 : index
    %2 = vector.load %arg1[%c0_2, %c1, %c0_3] : memref<1x2x32xf32, #tpu.memory_space<vmem>>, vector<1x1x32xf32>
    %3 = vector.shape_cast %2 : vector<1x1x32xf32> to vector<1x32xf32>
    %4 = tpu.iota {dimensions = array<i32: 0>} : vector<8x1xi32>
    %5 = arith.sitofp %4 : vector<8x1xi32> to vector<8x1xf32>
    %6 = vector.broadcast %5 : vector<8x1xf32> to vector<8x32xf32>
    %7 = vector.broadcast %1 : vector<1x32xf32> to vector<8x32xf32>
    %8 = arith.mulf %6, %7 : vector<8x32xf32>
    %9 = vector.broadcast %3 : vector<1x32xf32> to vector<8x32xf32>
    %10 = arith.addf %8, %9 : vector<8x32xf32>
    %11 = math.sin %10 : vector<8x32xf32>
    %c0_4 = arith.constant 0 : index
    %c0_5 = arith.constant 0 : index
    %c0_6 = arith.constant 0 : index
    %12 = vector.load %arg2[%c0_4, %c0_5, %c0_6] : memref<1x8x32xf32, #tpu.memory_space<vmem>>, vector<1x8x32xf32>
    %13 = vector.shape_cast %12 : vector<1x8x32xf32> to vector<8x32xf32>
    %14 = vector.shape_cast %11 : vector<8x32xf32> to vector<1x8x32xf32>
    tpu.vector_store %arg2[%c0_4, %c0_5, %c0_6], %14 {strides = array<i32>} : memref<1x8x32xf32, #tpu.memory_space<vmem>>, vector<1x8x32xf32>,
    return
  }
  func.func @transform_0(%arg0: i32) -> (i32, i32, i32) {
    %c0_i32 = arith.constant 0 : i32
    %c0_i32_0 = arith.constant 0 : i32
    %c0_i32_1 = arith.constant 0 : i32
    return %arg0, %c0_i32, %c0_i32_0 : i32, i32, i32
  }
  func.func @transform_1(%arg0: i32) -> (i32, i32, i32) {
    %c0_i32 = arith.constant 0 : i32
    %c0_i32_0 = arith.constant 0 : i32
    %c0_i32_1 = arith.constant 0 : i32
    return %c0_i32, %arg0, %c0_i32_0 : i32, i32, i32
  }
}

</mosaic_0001>

<bundles_post_ra>
// kernel: tpu_custom_call.1
= control target key start
LH: loop header
LB: loop body
LE: loop exit
PB: predicated region body
PF: predicated region fallthrough
CT: control target
= control target key end

     0   :  { %6 = vsyncpa [#allocation3], 0  ;;  %s268_s0 = inlined_call_operand.hbm [shape: f32[1,2,32], index: 0, kind: input, shape index: {}]   ;;  %s269_s1 = inlined_call_operand.hbm [shape: f32[1,8,32], index: 1, kind: output, shape index: {}]  }
   0x1   :  { %7 = vsyncpa [#allocation4], 0  ;;  %s223_s6 = smov [#allocation2]  }
   0x2   :  { %s14_s7 = sshll.u32 %s223_s6, 4  ;;  %s15_s7 = int_to_ptr.vmem [resolvable:$true] %s14_s7 }
   0x3   :  { %s187_s8 = scalar_lea.vmem %s15_s7, 32  ;;  %p192_p1 = scmp.lt.s32.totalorder %s15_s7, %s15_s7 }
   0x4   :  { %p188_p0 = scmp.ne.s32.totalorder %s15_s7, %s187_s8  ;;  %p193_p2 = scmp.lt.s32.totalorder %s187_s8, %s187_s8 }
   0x6   :  { %p194_p3 = por %p193_p2, %p192_p1 }
   0x8   :  { %p195_p4 = pnand %p194_p3, %p188_p0 }
   0xa   :  { %198 = shalt.err (!%p195_p4)
}
   0xb   :  { %17 = dma.hbm_to_vmem [thread:$0]  %s268_s0, 32, %s15_s7, [#allocation3]  }
   0xc   :  { %219 = dma.done.wait [#allocation3], 32  }
   0xd   :  { %220 = vsyncadd [#allocation3], 4294967264  ;;  %v23_v0 = vlaneseq  ;;  %v157_v3 = vld [vmem:[#allocation2] ss:$0 sm:$0xff]  ;;  %v158_v4 = vld [vmem:[#allocation2 + $0x1] ss:$0 sm:$0xff] }
   0xe   :  { %v224_v18 = vmov 683565275   ;;  %v225_v20 = vmov 2475754826   ;;  %v226_v22 = vmov 2131351028  }
   0xf   :  { %v24_v1 = vshrl.u32 %v23_v0, 7  ;;  %v227_v24 = vmov 2102212464   ;;  %v228_v26 = vmov 920167782   ;;  %s230_s0 = smov [#allocation5]  }
  0x10   :  { %v229_v33 = vmov 1326507024   ;;  %s148_s11 = sshll.u32 %s230_s0, 4  ;;  %vm140_vm13 = vcmask 261120   ;;  %s149_s11 = int_to_ptr.vmem [resolvable:$true] %s148_s11 }
  0x11   :  { %v25_v2 = vcvt.s32.f32 %v24_v1  ;;  %s199_s12 = scalar_lea.vmem %s149_s11, 128  ;;  %p204_p6 = scmp.lt.s32.totalorder %s149_s11, %s149_s11 }
  0x12   :  { %p200_p5 = scmp.ne.s32.totalorder %s149_s11, %s199_s12  ;;  %p205_p7 = scmp.lt.s32.totalorder %s199_s12, %s199_s12 }
  0x13   :  { %v30_v5 = vmul.f32 %v157_v3, %v25_v2 }
  0x14   :  { %p206_p8 = por %p205_p7, %p204_p6 }
  0x15   :  { %v244_v6 = vadd.f32 %v158_v4, %v30_v5 }
  0x16   :  { %p207_p9 = pnand %p206_p8, %p200_p5 }
  0x17   :  { %v39_v7 = vand.u32 2139095040, %v244_v6  ;;  %v36_v9 = vand.u32 2147483647, %v244_v6  ;;  %vm38_vm7 = vcmp.lt.s32.totalorder %v244_v6, 0  ;;  %vm128_vm12 = vweird.f32 %v244_v6 }
  0x19   :  { %v40_v8 = vshrl.u32 %v39_v7, 23  ;;  %v43_v12 = vand.u32 8388607, %v36_v9  ;;  %vm37_vm8 = vcmp.le.f32.partialorder %v36_v9, 0.7853982 }
  0x1b   :  { %v159_v10 = vadd.s32 4294967169, %v40_v8  ;;  %v44_v15 = vor.u32 8388608, %v43_v12 }
  0x1d   :  { %v46_v11 = vadd.s32 1, %v159_v10  ;;  %v84_v35 = vshll.u32 %v44_v15, 8 }
  0x1f   :  { %vm47_vm0 = vcmp.gt.s32.totalorder %v46_v11, 0 }
  0x20   :  { %v48_v13 = vsel %vm47_vm0, %v46_v11, 0 }
  0x21   :  { %v50_v14 = vand.u32 31, %v48_v13  ;;  %v49_v16 = vshrl.u32 %v48_v13, 5 }
  0x23   :  { %v51_v17 = vsub.s32 32, %v50_v14  ;;  %v53_v19 = vshll.u32 %v224_v18, %v50_v14  ;;  %v56_v21 = vshll.u32 %v225_v20, %v50_v14  ;;  %v59_v23 = vshll.u32 %v226_v22, %v50_v14 }
  0x24   :  { %v62_v25 = vshll.u32 %v227_v24, %v50_v14  ;;  %v65_v27 = vshll.u32 %v228_v26, %v50_v14  ;;  %vm68_vm1 = vcmp.lt.s32.totalorder %v49_v16, 1  ;;  %vm71_vm2 = vcmp.lt.s32.totalorder %v49_v16, 4 }
  0x25   :  { %v52_v28 = vshrl.u32 %v224_v18, %v51_v17  ;;  %v54_v29 = vshrl.u32 %v225_v20, %v51_v17  ;;  %v57_v30 = vshrl.u32 %v226_v22, %v51_v17  ;;  %v60_v31 = vshrl.u32 %v227_v24, %v51_v17 }
  0x26   :  { %v63_v32 = vshrl.u32 %v228_v26, %v51_v17  ;;  %v66_v34 = vshrl.u32 %v229_v33, %v51_v17  ;;  %vm69_vm3 = vcmp.lt.s32.totalorder %v49_v16, 2  ;;  %vm70_vm4 = vcmp.lt.s32.totalorder %v49_v16, 3 }
  0x27   :  { %v55_v36 = vor.u32 %v54_v29, %v53_v19  ;;  %v58_v37 = vor.u32 %v57_v30, %v56_v21  ;;  %v61_v38 = vor.u32 %v60_v31, %v59_v23 }
  0x28   :  { %v64_v39 = vor.u32 %v63_v32, %v62_v25  ;;  %v67_v40 = vor.u32 %v66_v34, %v65_v27 }
  0x29   :  { %v72_v41 = vsel %vm68_vm1, %v52_v28, %v55_v36  ;;  %v73_v42 = vsel %vm71_vm2, %v61_v38, 2102212464  ;;  %v76_v43 = vsel %vm68_vm1, %v55_v36, %v58_v37  ;;  %v80_v44 = vsel %vm68_vm1, %v58_v37, %v61_v38 }
  0x2a   :  { %v74_v45 = vsel %vm70_vm4, %v58_v37, %v73_v42  ;;  %v77_v46 = vsel %vm71_vm2, %v64_v39, 920167782  ;;  %v81_v47 = vsel %vm71_vm2, %v67_v40, 1326507024 }
  0x2b   :  { %v78_v48 = vsel %vm70_vm4, %v61_v38, %v77_v46  ;;  %v82_v49 = vsel %vm70_vm4, %v64_v39, %v81_v47  ;;  %v75_v50 = vsel %vm69_vm3, %v72_v41, %v74_v45 }
  0x2c   :  { %v79_v51 = vsel %vm69_vm3, %v76_v43, %v78_v48  ;;  %v83_v52 = vsel %vm69_vm3, %v80_v44, %v82_v49  ;;  %v91_v57 = vmul.u32 %v84_v35, %v75_v50 }
  0x2d   :  { %v250_v53 = vmul.u32.u64.low %v84_v35, %v83_v52  ;;  %v251_v54 = vmul.u32.u64.high %v84_v35, %v83_v52, %v250_v53  ;;  %v253_v55 = vmul.u32.u64.low %v84_v35, %v79_v51  ;;  %v254_v56 = vmul.u32.u64.high %v84_v35, %v79_v51, %v253_v55 }
  0x2f   :  { %vm93_vm5 = vc.u32 %v251_v54, %v253_v55  ;;  %v94_v58 = vadd.s32 1, %v254_v56  ;;  %v92_v5 = vadd.s32 %v253_v55, %v251_v54 }
  0x31   :  { %v95_v59 = vsel %vm93_vm5, %v94_v58, %v254_v56 }
  0x32   :  { %v96_v60 = vadd.s32 %v95_v59, %v91_v57 }
  0x34   :  { %v97_v61 = vadd.s32 536870912, %v96_v60 }
  0x36   :  { %v98_v62 = vshrl.u32 %v97_v61, 30 }
  0x38   :  { %v99_v63 = vshll.u32 %v98_v62, 30  ;;  %v122_v20 = vsub.s32 4, %v98_v62 }
  0x3a   :  { %v100_v0 = vsub.s32 %v96_v60, %v99_v63  ;;  %v123_v23 = vsel %vm38_vm7, %v122_v20, %v98_v62 }
  0x3b   :  { %v125_v25 = vsel %vm37_vm8, 0, %v123_v23 }
  0x3c   :  { %v102_v1 = vsub.s32 0, %v100_v0  ;;  %v129_v26 = vadd.s32 3, %v125_v25 }
  0x3e   :  { %v160_v2 = vmin.u32 %v102_v1, %v100_v0  ;;  %v130_v27 = vand.u32 3, %v129_v26 }
  0x40   :  { %v104_v3 = vclz %v160_v2  ;;  %vm135_vm9 = vcmp.eq.s32.totalorder %v130_v27, 2  ;;  %vm132_vm10 = vcmp.eq.s32.totalorder %v130_v27, 0  ;;  %vm131_vm11 = vcmp.lt.s32.totalorder %v130_v27, 2 }
  0x42   :  { %v161_v4 = vadd.s32 4294967294, %v104_v3 }
  0x44   :  { %vm162_vm6 = vcmp.lt.s32.totalorder %v161_v4, 0 }
  0x45   :  { %v107_v7 = vsel %vm162_vm6, 0, %v161_v4 }
  0x46   :  { %v108_v8 = vsub.s32 32, %v107_v7  ;;  %v109_v10 = vshll.u32 %v100_v0, %v107_v7  ;;  %v112_v11 = vsub.s32 4294967266, %v107_v7 }
  0x48   :  { %v110_v12 = vshrl.u32 %v92_v5, %v108_v8  ;;  %v113_v13 = vadd.s32 127, %v112_v11 }
  0x4a   :  { %v111_v14 = vor.u32 %v110_v12, %v109_v10  ;;  %v114_v15 = vshll.u32 %v113_v13, 23 }
  0x4c   :  { %v115_v16 = vor.u32 4788187, %v114_v15  ;;  %v118_v17 = vcvt.s32.f32 %v111_v14 }
  0x4e   :  { %v116_v18 = vand.u32 2147483647, %v115_v16 }
  0x50   :  { %v119_v19 = vmul.f32 %v118_v17, %v116_v18 }
  0x52   :  { %v120_v21 = vxor.u32 2147483648, %v119_v19 }
  0x54   :  { %v121_v22 = vsel %vm38_vm7, %v120_v21, %v119_v19 }
  0x55   :  { %v124_v24 = vsel %vm37_vm8, %v244_v6, %v121_v22 }
  0x56   :  { %175 = vcosq.f32 %v124_v24 }
  0x57   :  { %177 = vsinq.f32 %v124_v24 }
  0x63   :  { %v176_v28 = vpop.eup %175 }
  0x64   :  { %v178_v29 = vpop.eup %177  ;;  %v136_v30 = vxor.u32 2147483648, %v176_v28 }
  0x65   :  { %v133_v31 = vxor.u32 2147483648, %v178_v29 }
  0x66   :  { %v137_v9 = vsel %vm135_vm9, %v136_v30, %v178_v29 }
  0x67   :  { %v134_v32 = vsel %vm132_vm10, %v176_v28, %v133_v31 }
  0x68   :  { %v138_v33 = vsel %vm131_vm11, %v134_v32, %v137_v9 }
  0x69   :  { %v139_v34 = vsel %vm128_vm12, nan, %v138_v33 }
  0x6a   :  { %141 = vst.msk [vmem:[#allocation5] sm:$0xff] %vm140_vm13, %v139_v34 }
  0x6b   :  { %210 = shalt.err (!%p207_p9)
}
  0x6c   :  { %151 = dma.vmem_to_hbm [thread:$0]  %s149_s11, 128, %s269_s1, [#allocation4]  }
  0x6d   :  { %221 = dma.done.wait [#allocation4], 128  }
  0x6e   :  { %222 = vsyncadd [#allocation4], 4294967168 }
  0x6f   :  { %155 = vsyncpa [#allocation3], 1 }
  0x70   :  { %156 = vsyncpa [#allocation4], 1 }

</bundles_post_ra>
